<compile_context>
chip_gen: v5e
topology: v5e:2x2
jax: 0.10.0
libtpu: 0.0.40
codegen_flags: <defaults>
</compile_context>

<pallas_src>
import jax
import jax.numpy as jnp
from jax.experimental import pallas as pl
from jax.experimental.pallas import tpu as pltpu


def _round_up(x, m):
    return ((x + m - 1) // m) * m


def _epilogue(acc_f32, b_ref, w_s, b_s, out_dtype):
    out = acc_f32 * jnp.float32(w_s)
    if b_ref is not None:
        out = out + b_ref[...].astype(jnp.float32) * jnp.float32(b_s)
    out = jnp.where(out >= 0, out, jnp.float32(0.2) * out)
    return out.astype(out_dtype)


def _make_fc_kernel_multi_k(w_lrmul, b_lrmul, has_bias):
    """3-D grid kernel: K reduction with resident f32 accumulator."""
    w_s = float(w_lrmul)
    b_s = float(b_lrmul)

    if has_bias:
        def fc_kernel(x_ref, w_ref, b_ref, o_ref, acc_ref):
            k = pl.program_id(2)

            @pl.when(k == 0)
            def _():
                acc_ref[...] = jnp.zeros_like(acc_ref)

            acc_ref[...] += jnp.dot(x_ref[...], w_ref[...],
                                    preferred_element_type=jnp.float32)

            @pl.when(k == pl.num_programs(2) - 1)
            def _():
                o_ref[...] = _epilogue(acc_ref[...], b_ref, w_s, b_s,
                                       o_ref.dtype)

        return fc_kernel
    else:
        def fc_kernel(x_ref, w_ref, o_ref, acc_ref):
            k = pl.program_id(2)

            @pl.when(k == 0)
            def _():
                acc_ref[...] = jnp.zeros_like(acc_ref)

            acc_ref[...] += jnp.dot(x_ref[...], w_ref[...],
                                    preferred_element_type=jnp.float32)

            @pl.when(k == pl.num_programs(2) - 1)
            def _():
                o_ref[...] = _epilogue(acc_ref[...], None, w_s, b_s,
                                       o_ref.dtype)

        return fc_kernel


def _make_fc_kernel_single_k(w_lrmul, b_lrmul, has_bias):
    """2-D grid kernel: whole K in one tile, no scratch accumulator."""
    w_s = float(w_lrmul)
    b_s = float(b_lrmul)

    if has_bias:
        def fc_kernel(x_ref, w_ref, b_ref, o_ref):
            acc = jnp.dot(x_ref[...], w_ref[...],
                          preferred_element_type=jnp.float32)
            o_ref[...] = _epilogue(acc, b_ref, w_s, b_s, o_ref.dtype)

        return fc_kernel
    else:
        def fc_kernel(x_ref, w_ref, o_ref):
            acc = jnp.dot(x_ref[...], w_ref[...],
                          preferred_element_type=jnp.float32)
            o_ref[...] = _epilogue(acc, None, w_s, b_s, o_ref.dtype)

        return fc_kernel


def fc_pallas_forward(x, w_kn, bias, w_lrmul, b_lrmul, *,
                      tm=256, tn=512, tk=512):
    """leaky_relu((x @ w_kn) * w_lrmul + bias * b_lrmul, 0.2).

    x:    [M, K]
    w_kn: [K, N]  (pre-transposed weight)
    bias: [N] or None
    """
    M, K = x.shape
    Kw, N = w_kn.shape
    assert K == Kw, (K, Kw)
    out_dtype = x.dtype
    has_bias = bias is not None

    # Clamp tiles to the padded problem size; keep (8, 128) alignment so the
    # output tile stays lane-dense (unmasked vst path).
    tm = min(tm, _round_up(M, 8))
    tn = min(tn, _round_up(N, 128))
    tk = min(tk, _round_up(K, 128))

    Mp = _round_up(M, tm)
    Np = _round_up(N, tn)
    Kp = _round_up(K, tk)

    xp = x if (Mp == M and Kp == K) else jnp.pad(x, ((0, Mp - M), (0, Kp - K)))
    wp = (w_kn if (Kp == K and Np == N)
          else jnp.pad(w_kn, ((0, Kp - K), (0, Np - N))))

    k_steps = Kp // tk
    single_k = (k_steps == 1)

    args = [xp, wp]
    if has_bias:
        bp = bias.reshape(1, N)
        if Np != N:
            bp = jnp.pad(bp, ((0, 0), (0, Np - N)))
        args.append(bp)

    itemsize = jnp.dtype(out_dtype).itemsize
    cost = pl.CostEstimate(
        flops=2 * Mp * Np * Kp,
        transcendentals=0,
        bytes_accessed=(xp.size * xp.dtype.itemsize
                        + wp.size * wp.dtype.itemsize
                        + Mp * Np * itemsize),
    )

    if single_k:
        grid = (Mp // tm, Np // tn)
        in_specs = [
            pl.BlockSpec((tm, tk), lambda i, j: (i, 0)),   # x tile
            pl.BlockSpec((tk, tn), lambda i, j: (0, j)),   # W^T tile [K, N]
        ]
        if has_bias:
            in_specs.append(pl.BlockSpec((1, tn), lambda i, j: (0, j)))
        out_specs = pl.BlockSpec((tm, tn), lambda i, j: (i, j))
        scratch_shapes = []
        dim_sem = ("parallel", "parallel")
        kernel = _make_fc_kernel_single_k(
            w_lrmul, b_lrmul if has_bias else 1.0, has_bias)
    else:
        grid = (Mp // tm, Np // tn, k_steps)
        in_specs = [
            pl.BlockSpec((tm, tk), lambda i, j, k: (i, k)),   # x tile
            pl.BlockSpec((tk, tn), lambda i, j, k: (k, j)),   # W^T tile [K, N]
        ]
        if has_bias:
            in_specs.append(pl.BlockSpec((1, tn), lambda i, j, k: (0, j)))
        out_specs = pl.BlockSpec((tm, tn), lambda i, j, k: (i, j))
        scratch_shapes = [pltpu.VMEM((tm, tn), jnp.float32)]
        dim_sem = ("parallel", "parallel", "arbitrary")
        kernel = _make_fc_kernel_multi_k(
            w_lrmul, b_lrmul if has_bias else 1.0, has_bias)

    out = pl.pallas_call(
        kernel,
        out_shape=jax.ShapeDtypeStruct((Mp, Np), out_dtype),
        grid_spec=pltpu.PrefetchScalarGridSpec(
            num_scalar_prefetch=0,
            grid=grid,
            in_specs=in_specs,
            out_specs=out_specs,
            scratch_shapes=scratch_shapes,
        ),
        compiler_params=pltpu.CompilerParams(dimension_semantics=dim_sem),
        cost_estimate=cost,
    )(*args)

    if Mp != M or Np != N:
        out = out[:M, :N]
    return out


class FCPallas:
    """JAX/Pallas port of the PyTorch FC module."""

    def __init__(self, in_channels, out_channels, gain=2 ** 0.5,
                 use_wscale=False, lrmul=1.0, bias=True, *,
                 key=jax.random.PRNGKey(0), dtype=jnp.float32):
        he_std = gain * in_channels ** (-0.5)
        if use_wscale:
            init_std = 1.0 / lrmul
            self.w_lrmul = he_std * lrmul
        else:
            init_std = he_std / lrmul
            self.w_lrmul = lrmul

        wkey, _ = jax.random.split(key)
        # torch.randn(out, in) * init_std  -> deterministic JAX equivalent.
        self.weight = (jax.random.normal(wkey, (out_channels, in_channels),
                                         dtype=jnp.float32)
                       * init_std).astype(dtype)
        # One-time transpose to [K, N]; the kernel never transposes.
        self.weight_kn = jnp.asarray(self.weight.T)

        if bias:
            self.bias = jnp.zeros((out_channels,), dtype=dtype)
            self.b_lrmul = lrmul
        else:
            self.bias = None
            self.b_lrmul = None

        self.in_channels = in_channels
        self.out_channels = out_channels
        self.dtype = dtype

    def __call__(self, x, **tile_kw):
        # x: [batch, in_channels]
        assert x.shape[-1] == self.in_channels
        return fc_pallas_forward(
            x, self.weight_kn, self.bias, self.w_lrmul,
            self.b_lrmul if self.bias is not None else 1.0, **tile_kw)


def fc_reference(x, weight_oi, bias, w_lrmul, b_lrmul):
    """Pure-JAX reference matching PyTorch FC.forward."""
    out = x @ (weight_oi * w_lrmul).T
    if bias is not None:
        out = out + bias.reshape(-1) * b_lrmul
    return jnp.where(out >= 0, out, 0.2 * out)


if __name__ == "__main__":
    key = jax.random.PRNGKey(0)
    xkey, pkey = jax.random.split(key)

    # Small demo shape (module takes [batch, in_channels]).
    batch, in_channels, out_channels = 8, 32, 64
    x = jax.random.normal(xkey, (batch, in_channels), dtype=jnp.float32)

    fc = FCPallas(in_channels, out_channels, use_wscale=True, lrmul=1.0,
                  bias=True, key=pkey)
    out = jax.block_until_ready(fc(x))           # single-K fast path
    ref = fc_reference(x, fc.weight, fc.bias, fc.w_lrmul, fc.b_lrmul)
    assert out.shape == (batch, out_channels)
    assert jnp.allclose(out, ref, atol=1e-5, rtol=1e-5), "mismatch vs reference"

    # Second config with small explicit tiles to exercise the multi-tile
    # (M, N, K) grid, the K-reduction accumulator and the epilogue path.
    b2, k2, n2 = 16, 256, 256
    x2 = jax.random.normal(jax.random.PRNGKey(1), (b2, k2), dtype=jnp.float32)
    fc2 = FCPallas(k2, n2, use_wscale=False, lrmul=0.5, bias=True,
                   key=jax.random.PRNGKey(2))
    # Non-zero bias to exercise the bias branch of the epilogue.
    fc2.bias = 0.1 * jax.random.normal(jax.random.PRNGKey(3), (n2,),
                                       dtype=jnp.float32)
    out2 = jax.block_until_ready(fc2(x2, tm=8, tn=128, tk=128))
    ref2 = fc_reference(x2, fc2.weight, fc2.bias, fc2.w_lrmul, fc2.b_lrmul)
    assert out2.shape == (b2, n2)
    assert jnp.allclose(out2, ref2, atol=1e-4, rtol=1e-4), "tiled mismatch"

    # No-bias path, single-K grid.
    fc3 = FCPallas(32, 128, use_wscale=True, lrmul=1.0, bias=False,
                   key=jax.random.PRNGKey(4))
    out3 = jax.block_until_ready(fc3(x))
    ref3 = fc_reference(x, fc3.weight, None, fc3.w_lrmul, 1.0)
    assert jnp.allclose(out3, ref3, atol=1e-5, rtol=1e-5), "no-bias mismatch"

    print("KERNEL_OK")
</pallas_src>

<mosaic_0001>
module attributes {stable_mosaic.version = 11 : i64} {
  func.func @fc_kernel(%arg0: i32, %arg1: i32, %arg2: memref<8x128xf32, #tpu.memory_space<vmem>>, %arg3: memref<128x128xf32, #tpu.memory_space<vmem>>, %arg4: memref<1x128xf32, #tpu.memory_space<vmem>>, %arg5: memref<8x128xf32, #tpu.memory_space<vmem>>) attributes {dimension_semantics = [#tpu.dimension_semantics<parallel>, #tpu.dimension_semantics<parallel>], iteration_bounds = array<i64: 1, 1>, scalar_prefetch = 0 : i64, scratch_operands = 0 : i64, tpu.core_type = #tpu.core_type<tc>, window_params = [{transform_indices = @transform_0, window_bounds = array<i64: 8, 128>}, {transform_indices = @transform_1, window_bounds = array<i64: 128, 128>}, {transform_indices = @transform_2, window_bounds = array<i64: 1, 128>}, {transform_indices = @transform_3, window_bounds = array<i64: 8, 128>}]} {
    %c0 = arith.constant 0 : index
    %c0_0 = arith.constant 0 : index
    %0 = vector.load %arg2[%c0, %c0_0] : memref<8x128xf32, #tpu.memory_space<vmem>>, vector<8x128xf32>
    %c0_1 = arith.constant 0 : index
    %c0_2 = arith.constant 0 : index
    %1 = vector.load %arg3[%c0_1, %c0_2] : memref<128x128xf32, #tpu.memory_space<vmem>>, vector<128x128xf32>
    %cst = arith.constant dense<0.000000e+00> : vector<8x128xf32>
    %2 = tpu.matmul %0, %1, %cst {dimension_numbers = #tpu.dot_dimension_numbers<[1], [0], [0], [1], [0, 0, 1, 1], [], []>} : vector<8x128xf32>, vector<128x128xf32>, vector<8x128xf32> -> vector<8x128xf32>
    %cst_3 = arith.constant 2.500000e-01 : f32
    %3 = vector.broadcast %cst_3 : f32 to vector<8x128xf32>
    %4 = arith.mulf %2, %3 : vector<8x128xf32>
    %c0_4 = arith.constant 0 : index
    %c0_5 = arith.constant 0 : index
    %5 = vector.load %arg4[%c0_4, %c0_5] : memref<1x128xf32, #tpu.memory_space<vmem>>, vector<1x128xf32>
    %cst_6 = arith.constant 1.000000e+00 : f32
    %6 = vector.broadcast %cst_6 : f32 to vector<1x128xf32>
    %7 = arith.mulf %5, %6 : vector<1x128xf32>
    %8 = vector.broadcast %7 : vector<1x128xf32> to vector<8x128xf32>
    %9 = arith.addf %4, %8 : vector<8x128xf32>
    %cst_7 = arith.constant 0.000000e+00 : f32
    %10 = vector.broadcast %cst_7 : f32 to vector<8x128xf32>
    %11 = arith.cmpf oge, %9, %10 : vector<8x128xf32>
    %cst_8 = arith.constant 2.000000e-01 : f32
    %12 = vector.broadcast %cst_8 : f32 to vector<8x128xf32>
    %13 = arith.mulf %12, %9 : vector<8x128xf32>
    %14 = arith.select %11, %9, %13 : vector<8x128xi1>, vector<8x128xf32>
    %c0_9 = arith.constant 0 : index
    %c0_10 = arith.constant 0 : index
    %15 = vector.load %arg5[%c0_9, %c0_10] : memref<8x128xf32, #tpu.memory_space<vmem>>, vector<8x128xf32>
    tpu.vector_store %arg5[%c0_9, %c0_10], %14 {strides = array<i32>} : memref<8x128xf32, #tpu.memory_space<vmem>>, vector<8x128xf32>,
    return
  }
  func.func @transform_0(%arg0: i32, %arg1: i32) -> (i32, i32) {
    %c0_i32 = arith.constant 0 : i32
    %c0_i32_0 = arith.constant 0 : i32
    return %arg0, %c0_i32 : i32, i32
  }
  func.func @transform_1(%arg0: i32, %arg1: i32) -> (i32, i32) {
    %c0_i32 = arith.constant 0 : i32
    %c0_i32_0 = arith.constant 0 : i32
    return %c0_i32, %arg1 : i32, i32
  }
  func.func @transform_2(%arg0: i32, %arg1: i32) -> (i32, i32) {
    %c0_i32 = arith.constant 0 : i32
    %c0_i32_0 = arith.constant 0 : i32
    return %c0_i32, %arg1 : i32, i32
  }
  func.func @transform_3(%arg0: i32, %arg1: i32) -> (i32, i32) {
    %c0_i32 = arith.constant 0 : i32
    return %arg0, %arg1 : i32, i32
  }
}

</mosaic_0001>

<bundles_post_ra>
// kernel: tpu_custom_call.1
= control target key start
LH: loop header
LB: loop body
LE: loop exit
PB: predicated region body
PF: predicated region fallthrough
CT: control target
= control target key end

     0   :  { %8 = vsyncpa [#allocation3], 0  ;;  %s231_s0 = inlined_call_operand.hbm [shape: f32[8,128], index: 0, kind: input, shape index: {}]   ;;  %s232_s1 = inlined_call_operand.hbm [shape: f32[128,128], index: 1, kind: input, shape index: {}]   ;;  %s233_s2 = inlined_call_operand.vmem [shape: f32[1,128], index: 2, kind: input, shape index: {}]   ;;  %s234_s3 = inlined_call_operand.hbm [shape: f32[8,128], index: 3, kind: output, shape index: {}]  }
   0x1   :  { %9 = vsyncpa [#allocation6], 0 }
   0x2   :  { %10 = vsyncpa [#allocation4], 0  ;;  %s16_s14 = sshll.u32 %s231_s0, 4  ;;  %s194_s15 = smov [#allocation2]   ;;  %s17_s14 = int_to_ptr.hbm [resolvable:$true] %s16_s14 }
   0x3   :  { %s18_s16 = sshll.u32 %s194_s15, 4  ;;  %s26_s19 = sshll.u32 %s232_s1, 4  ;;  %s19_s16 = int_to_ptr.vmem [resolvable:$true] %s18_s16  ;;  %s27_s19 = int_to_ptr.hbm [resolvable:$true] %s26_s19 }
   0x4   :  { %21 = dma.hbm_to_vmem [thread:$0]  %s17_s14, 128, %s19_s16, [#allocation3]  }
   0x5   :  { %s195_s20 = smov [#allocation5]   ;;  %s196_s22 = smov 128  }
   0x6   :  { %s28_s21 = sshll.u32 %s195_s20, 4  ;;  %s197_s23 = smov 8   ;;  %s29_s21 = int_to_ptr.vmem [resolvable:$true] %s28_s21 }
   0x7   :  { %34 = dma.hbm_to_vmem [thread:$0]  %s27_s19, 2048, %s29_s21, [#allocation6], %s196_s22, %s196_s22, %s197_s23  }
   0x8   :  { %188 = dma.done.wait [#allocation3], 128  }
   0x9   :  { %189 = vsyncadd [#allocation3], 4294967168 }
   0xa   :  { %190 = dma.done.wait [#allocation6], 2048  }
   0xb   :  { %191 = vsyncadd [#allocation6], 4294965248  ;;  %v61_v0 = vld [vmem:[#allocation5 + $0x78] sm:$0xff]  ;;  %v60_v1 = vld [vmem:[#allocation5 + $0x70] sm:$0xff]  ;;  %s198_s24 = smov [#allocation7]   ;;  %s99_s28 = sshll.u32 %s234_s3, 4  ;;  %s100_s28 = int_to_ptr.hbm [resolvable:$true] %s99_s28 }
   0xc   :  { %62 = vmatpush.msra.mxu0 %v61_v0  ;;  %v59_v2 = vld [vmem:[#allocation5 + $0x68] sm:$0xff]  ;;  %v58_v3 = vld [vmem:[#allocation5 + $0x60] sm:$0xff]  ;;  %v57_v4 = vld [vmem:[#allocation5 + $0x58] sm:$0xff]  ;;  %s97_s25 = sshll.u32 %s198_s24, 4  ;;  %s98_s25 = int_to_ptr.vmem [resolvable:$true] %s97_s25 }
   0xd   :  { %v56_v5 = vld [vmem:[#allocation5 + $0x50] sm:$0xff]  ;;  %v55_v6 = vld [vmem:[#allocation5 + $0x48] sm:$0xff]  ;;  %v54_v7 = vld [vmem:[#allocation5 + $0x40] sm:$0xff] }
   0xe   :  { %63 = vmatpush.msra.mxu0 %v60_v1  ;;  %v53_v8 = vld [vmem:[#allocation5 + $0x38] sm:$0xff]  ;;  %v52_v9 = vld [vmem:[#allocation5 + $0x30] sm:$0xff]  ;;  %v51_v10 = vld [vmem:[#allocation5 + $0x28] sm:$0xff] }
   0xf   :  { %v50_v11 = vld [vmem:[#allocation5 + $0x20] sm:$0xff]  ;;  %v49_v12 = vld [vmem:[#allocation5 + $0x18] sm:$0xff]  ;;  %v48_v13 = vld [vmem:[#allocation5 + $0x10] sm:$0xff] }
  0x10   :  { %64 = vmatpush.msra.mxu0 %v59_v2  ;;  %v47_v14 = vld [vmem:[#allocation5 + $0x8] sm:$0xff]  ;;  %v46_v15 = vld [vmem:[#allocation5] sm:$0xff]  ;;  %v45_v16 = vld [vmem:[#allocation2] sm:$0xff] }
  0x11   :  { %v115_v17 = vld [vmem:[%s233_s2] ss:$0 sm:$0xff] }
  0x12   :  { %65 = vmatpush.msra.mxu0 %v58_v3 }
  0x14   :  { %66 = vmatpush.msra.mxu0 %v57_v4 }
  0x16   :  { %67 = vmatpush.msra.mxu0 %v56_v5 }
  0x18   :  { %68 = vmatpush.msra.mxu0 %v55_v6 }
  0x1a   :  { %69 = vmatpush.msra.mxu0 %v54_v7 }
  0x1c   :  { %70 = vmatpush.msra.mxu0 %v53_v8 }
  0x1e   :  { %71 = vmatpush.msra.mxu0 %v52_v9 }
  0x20   :  { %72 = vmatpush.msra.mxu0 %v51_v10 }
  0x22   :  { %73 = vmatpush.msra.mxu0 %v50_v11 }
  0x24   :  { %74 = vmatpush.msra.mxu0 %v49_v12 }
  0x26   :  { %75 = vmatpush.msra.mxu0 %v48_v13 }
  0x28   :  { %76 = vmatpush.msra.mxu0 %v47_v14 }
  0x2a   :  { %77 = vmatpush.msra.mxu0 %v46_v15 }
  0x2b   :  { %78 = vmatmul.f32.vlgmr.msra.gmra.mxu0 %v45_v16 }
  0xa8   :  { %v79_v18 = vpop.f32.mrf.mxu0 }
  0xa9   :  { %v82_v19 = vmul.f32 0.25, %v79_v18 }
  0xab   :  { %v87_v20 = vadd.f32 %v115_v17, %v82_v19 }
  0xad   :  { %vm88_vm0 = vcmp.ge.f32.partialorder %v87_v20, 0.0  ;;  %v89_v21 = vmul.f32 0.2, %v87_v20 }
  0xaf   :  { %v90_v22 = vsel %vm88_vm0, %v87_v20, %v89_v21 }
  0xb0   :  { %91 = vst [vmem:[#allocation7] sm:$0xff] %v90_v22 }
  0xb1   :  { %102 = dma.vmem_to_hbm [thread:$0]  %s98_s25, 128, %s100_s28, [#allocation4]  }
  0xb2   :  { %192 = dma.done.wait [#allocation4], 128  }
  0xb3   :  { %193 = vsyncadd [#allocation4], 4294967168 }
  0xb4   :  { %107 = vsyncpa [#allocation3], 1 }
  0xb5   :  { %108 = vsyncpa [#allocation6], 1 }
  0xb6   :  { %109 = vsyncpa [#allocation4], 1 }

</bundles_post_ra>
